<compile_context>
chip_gen: v7x
topology: tpu7x:2x2x1
jax: 0.10.0
libtpu: 0.0.40
codegen_flags: <defaults>
</compile_context>

<pallas_src>
import jax
import jax.numpy as jnp
from jax.experimental import pallas as pl
from jax.experimental.pallas import tpu as pltpu

LANE = 128      # lane width (last dim)
SUBLANE = 16    # bf16 sublane packing (second-to-last dim)


def _round_up(n: int, m: int) -> int:
    return ((n + m - 1) // m) * m


def _pick_tile(dim: int, step: int, cap: int) -> int:
    """Largest multiple of `step` that divides `dim` and is <= cap."""
    cand = min(cap, dim)
    cand -= cand % step
    while cand >= step:
        if dim % cand == 0:
            return cand
        cand -= step
    return min(dim, step)


# --------------------------------------------------------------------------
# Kernels
# --------------------------------------------------------------------------
def _crlinear_fast_kernel(x_ref, wr_ref, wi_ref, br_ref, bi_ref,
                          or_ref, oi_ref):
    """Resident-weight path: full-K blocks, no reduction loop.

    x_ref : (2, tm, Inp) bf16   (row 0 = real, row 1 = imag)
    w*_ref: (Inp, tn)    bf16
    b*_ref: (1, tn)      f32
    o*_ref: (tm, tn)     f32
    """
    tm = or_ref.shape[0]
    x2 = x_ref[...].reshape(2 * tm, x_ref.shape[2])          # (2*tm, Inp)
    pr = jnp.dot(x2, wr_ref[...], preferred_element_type=jnp.float32)
    pi = jnp.dot(x2, wi_ref[...], preferred_element_type=jnp.float32)
    or_ref[...] = pr[:tm, :] - pi[tm:, :] + br_ref[...]
    oi_ref[...] = pr[tm:, :] + pi[:tm, :] + bi_ref[...]


def _crlinear_tiled_kernel(x_ref, wr_ref, wi_ref, br_ref, bi_ref,
                           or_ref, oi_ref):
    """General K-tiled path; accumulates directly into the f32 output blocks
    (resident across the k axis), bias folded into the k==0 init."""
    k = pl.program_id(2)
    tm = or_ref.shape[0]

    @pl.when(k == 0)
    def _init():
        or_ref[...] = jnp.broadcast_to(br_ref[...], or_ref.shape)
        oi_ref[...] = jnp.broadcast_to(bi_ref[...], oi_ref.shape)

    x2 = x_ref[...].reshape(2 * tm, x_ref.shape[2])           # (2*tm, tk)
    pr = jnp.dot(x2, wr_ref[...], preferred_element_type=jnp.float32)
    pi = jnp.dot(x2, wi_ref[...], preferred_element_type=jnp.float32)
    # Fused complex combine: 2 RMWs per step instead of 4.
    or_ref[...] += pr[:tm, :] - pi[tm:, :]
    oi_ref[...] += pr[tm:, :] + pi[:tm, :]


# --------------------------------------------------------------------------
# pallas_call wrapper
# --------------------------------------------------------------------------
def crlinear_pallas(x2, w_re, w_im, b_re, b_im, *,
                    force_tiled=False, tm_cap=512, tn_cap=512, tk_cap=512):
    """x2: (2, Bp, Inp) bf16 (packed re/im); w_*: (Inp, Outp) bf16;
    b_*: (1, Outp) f32.  All dims already padded to lane/sublane multiples."""
    _, Bp, Inp = x2.shape
    Outp = w_re.shape[1]

    # Tiles are divisors of the (lightly) padded dims -> no extra zero FLOPs.
    tm = _pick_tile(Bp, SUBLANE, tm_cap)
    tn = _pick_tile(Outp, LANE, tn_cap)
    tk = _pick_tile(Inp, LANE, tk_cap)

    # ---- fast path feasibility (full-K weight slabs resident in VMEM) ----
    fast_vmem = (
        2 * (2 * Inp * tn * 2)       # wr + wi blocks (bf16), double-buffered
        + 2 * (2 * tm * Inp * 2)     # packed x block (bf16), double-buffered
        + 2 * 2 * (tm * tn * 4)      # two f32 output blocks, double-buffered
        + 2 * 2 * (tn * 4)           # two bias blocks
    )
    use_fast = (not force_tiled) and fast_vmem <= 24 * 1024 * 1024

    out_shape = (jax.ShapeDtypeStruct((Bp, Outp), jnp.float32),
                 jax.ShapeDtypeStruct((Bp, Outp), jnp.float32))

    if use_fast:
        # v7x megacore: if M is a single block, try to give the N axis >= 2
        # blocks so both TensorCores get work (no-op on v5e/v6e).
        if Bp // tm == 1 and Outp // tn == 1 and (Outp // 2) % LANE == 0:
            tn = Outp // 2
        num_n = Outp // tn
        num_m = Bp // tm
        grid = (num_n, num_m)   # N outer: weight blocks stay resident over M

        flops = 8 * Bp * Inp * Outp
        bytes_accessed = (num_n * (2 * Bp * Inp * 2)     # x re-read per N tile
                          + 2 * Inp * Outp * 2           # weights, read once
                          + 2 * Bp * Outp * 4            # outputs
                          + 2 * Outp * 4)                # biases
        vmem_limit = int(min(56 << 20, max(32 << 20, 2 * fast_vmem)))

        return pl.pallas_call(
            _crlinear_fast_kernel,
            out_shape=out_shape,
            grid_spec=pltpu.PrefetchScalarGridSpec(
                num_scalar_prefetch=0,
                grid=grid,
                in_specs=[
                    pl.BlockSpec((2, tm, Inp), lambda j, i: (0, i, 0)),   # x
                    pl.BlockSpec((Inp, tn), lambda j, i: (0, j)),         # w_re
                    pl.BlockSpec((Inp, tn), lambda j, i: (0, j)),         # w_im
                    pl.BlockSpec((1, tn), lambda j, i: (0, j)),           # b_re
                    pl.BlockSpec((1, tn), lambda j, i: (0, j)),           # b_im
                ],
                out_specs=(
                    pl.BlockSpec((tm, tn), lambda j, i: (i, j)),
                    pl.BlockSpec((tm, tn), lambda j, i: (i, j)),
                ),
            ),
            compiler_params=pltpu.CompilerParams(
                dimension_semantics=("parallel", "parallel"),
                vmem_limit_bytes=vmem_limit),
            cost_estimate=pl.CostEstimate(flops=int(flops),
                                          transcendentals=0,
                                          bytes_accessed=int(bytes_accessed)),
        )(x2, w_re, w_im, b_re, b_im)

    # --------------------------- general tiled path ---------------------------
    num_m, num_n, num_k = Bp // tm, Outp // tn, Inp // tk
    grid = (num_m, num_n, num_k)

    tiled_vmem = (
        2 * (2 * tm * tk * 2)        # packed x block, double-buffered
        + 2 * 2 * (tk * tn * 2)      # wr + wi blocks, double-buffered
        + 2 * 2 * (tm * tn * 4)      # two f32 output blocks, double-buffered
        + 2 * 2 * (tn * 4)           # biases
    )
    vmem_limit = int(min(56 << 20, max(32 << 20, 2 * tiled_vmem)))

    flops = 8 * Bp * Inp * Outp
    bytes_accessed = (num_n * (2 * Bp * Inp * 2)      # x re-read per N tile
                      + num_m * (2 * Inp * Outp * 2)  # weights re-read per M tile
                      + 2 * Bp * Outp * 4             # outputs
                      + 2 * Outp * 4)                 # biases

    return pl.pallas_call(
        _crlinear_tiled_kernel,
        out_shape=out_shape,
        grid_spec=pltpu.PrefetchScalarGridSpec(
            num_scalar_prefetch=0,
            grid=grid,
            in_specs=[
                pl.BlockSpec((2, tm, tk), lambda i, j, k: (0, i, k)),   # x
                pl.BlockSpec((tk, tn), lambda i, j, k: (k, j)),         # w_re
                pl.BlockSpec((tk, tn), lambda i, j, k: (k, j)),         # w_im
                pl.BlockSpec((1, tn), lambda i, j, k: (0, j)),          # b_re
                pl.BlockSpec((1, tn), lambda i, j, k: (0, j)),          # b_im
            ],
            out_specs=(
                pl.BlockSpec((tm, tn), lambda i, j, k: (i, j)),
                pl.BlockSpec((tm, tn), lambda i, j, k: (i, j)),
            ),
        ),
        compiler_params=pltpu.CompilerParams(
            dimension_semantics=("parallel", "parallel", "arbitrary"),
            vmem_limit_bytes=vmem_limit),
        cost_estimate=pl.CostEstimate(flops=int(flops),
                                      transcendentals=0,
                                      bytes_accessed=int(bytes_accessed)),
    )(x2, w_re, w_im, b_re, b_im)


# --------------------------------------------------------------------------
# Parameter prep + forward wrapper (mirrors _CRLinear.forward)
# --------------------------------------------------------------------------
def prepare_params(w_re_pt, w_im_pt, b_re, b_im):
    """One-time prep: transpose (Out, In) -> (In, Out), pad to lane multiples,
    cast weights to bf16 (f32 accumulation in-kernel). Do NOT call per forward."""
    Out, In = w_re_pt.shape
    Inp = _round_up(In, LANE)
    Outp = _round_up(Out, LANE)

    def pad_w(w):
        w = jnp.transpose(jnp.asarray(w, jnp.float32))          # (In, Out)
        w = jnp.pad(w, ((0, Inp - In), (0, Outp - Out)))
        return w.astype(jnp.bfloat16)

    def pad_b(b):
        b = jnp.asarray(b, jnp.float32).reshape(1, Out)
        return jnp.pad(b, ((0, 0), (0, Outp - Out)))

    return dict(w_re=pad_w(w_re_pt), w_im=pad_w(w_im_pt),
                b_re=pad_b(b_re), b_im=pad_b(b_im),
                in_features=In, out_features=Out)


def crlinear_apply(params, x, **plan_kwargs):
    """x: complex (..., In) -> complex (..., Out)
       or real (..., In, 2) -> real (..., Out, 2)."""
    is_complex = jnp.iscomplexobj(x)
    if is_complex:
        x_re, x_im = jnp.real(x), jnp.imag(x)
    else:
        x_re, x_im = x[..., 0], x[..., 1]

    lead = x_re.shape[:-1]
    In, Out = params["in_features"], params["out_features"]
    Inp, Outp = params["w_re"].shape

    B = 1
    for d in lead:
        B *= int(d)
    B = max(B, 1)
    Bp = _round_up(B, SUBLANE)

    def prep(xp):
        xp = jnp.asarray(xp, jnp.float32).reshape(B, In)
        xp = jnp.pad(xp, ((0, Bp - B), (0, Inp - In)))
        return xp.astype(jnp.bfloat16)

    x2 = jnp.stack([prep(x_re), prep(x_im)], axis=0)     # (2, Bp, Inp)

    out_re_p, out_im_p = crlinear_pallas(
        x2, params["w_re"], params["w_im"], params["b_re"], params["b_im"],
        **plan_kwargs)

    out_re = out_re_p[:B, :Out].reshape(*lead, Out)
    out_im = out_im_p[:B, :Out].reshape(*lead, Out)
    if is_complex:
        return jax.lax.complex(out_re, out_im)
    return jnp.stack([out_re, out_im], axis=-1).astype(x.dtype)


# --------------------------------------------------------------------------
if __name__ == "__main__":
    key = jax.random.PRNGKey(0)

    # ---- main test: complex64 input, tiny layer (fast resident-weight path) ----
    in_features, out_features = 32, 32
    batch, seq = 2, 8
    k = jax.random.split(key, 6)
    bound = 1.0 / (in_features ** 0.5)
    w_re = jax.random.uniform(k[0], (out_features, in_features),
                              minval=-bound, maxval=bound, dtype=jnp.float32)
    w_im = jax.random.uniform(k[1], (out_features, in_features),
                              minval=-bound, maxval=bound, dtype=jnp.float32)
    b_re = jax.random.uniform(k[2], (out_features,),
                              minval=-bound, maxval=bound, dtype=jnp.float32)
    b_im = jax.random.uniform(k[3], (out_features,),
                              minval=-bound, maxval=bound, dtype=jnp.float32)
    x_re = jax.random.normal(k[4], (batch, seq, in_features), dtype=jnp.float32)
    x_im = jax.random.normal(k[5], (batch, seq, in_features), dtype=jnp.float32)
    x = jax.lax.complex(x_re, x_im)                       # complex64 (2, 8, 32)

    params = prepare_params(w_re, w_im, b_re, b_im)
    out = crlinear_apply(params, x)
    out = jax.block_until_ready(out)

    ref_re = x_re @ w_re.T + b_re - x_im @ w_im.T
    ref_im = x_im @ w_re.T + b_im + x_re @ w_im.T
    ref = jax.lax.complex(ref_re, ref_im)
    assert out.shape == (batch, seq, out_features)
    assert out.dtype == jnp.complex64
    # bf16 inputs with f32 accumulation -> looser tolerance vs f32 reference.
    assert jnp.allclose(out, ref, atol=3e-2, rtol=3e-2), \
        float(jnp.max(jnp.abs(out - ref)))

    # ---- secondary test: real (..., 2) input form, general K-tiled path ----
    kk = jax.random.split(jax.random.PRNGKey(1), 5)
    in2, out2, b2 = 256, 256, 32
    bound2 = 1.0 / (in2 ** 0.5)
    w2_re = jax.random.uniform(kk[0], (out2, in2), minval=-bound2, maxval=bound2)
    w2_im = jax.random.uniform(kk[1], (out2, in2), minval=-bound2, maxval=bound2)
    b2_re = jax.random.uniform(kk[2], (out2,), minval=-bound2, maxval=bound2)
    b2_im = jax.random.uniform(kk[3], (out2,), minval=-bound2, maxval=bound2)
    xr2 = jax.random.normal(kk[4], (b2, in2, 2), dtype=jnp.float32)

    params2 = prepare_params(w2_re, w2_im, b2_re, b2_im)
    out2_arr = crlinear_apply(params2, xr2, force_tiled=True,
                              tm_cap=16, tn_cap=128, tk_cap=128)  # grid (2,2,2)
    out2_arr = jax.block_until_ready(out2_arr)
    r2_re = xr2[..., 0] @ w2_re.T + b2_re - xr2[..., 1] @ w2_im.T
    r2_im = xr2[..., 1] @ w2_re.T + b2_im + xr2[..., 0] @ w2_im.T
    ref2 = jnp.stack([r2_re, r2_im], axis=-1)
    assert out2_arr.shape == (b2, out2, 2)
    assert jnp.allclose(out2_arr, ref2, atol=5e-2, rtol=5e-2), \
        float(jnp.max(jnp.abs(out2_arr - ref2)))

    print("KERNEL_OK")
</pallas_src>

<mosaic_0001>
module attributes {stable_mosaic.version = 11 : i64} {
  func.func @_crlinear_fast_kernel(%arg0: i32, %arg1: i32, %arg2: memref<2x16x128xbf16, #tpu.memory_space<vmem>>, %arg3: memref<128x128xbf16, #tpu.memory_space<vmem>>, %arg4: memref<128x128xbf16, #tpu.memory_space<vmem>>, %arg5: memref<1x128xf32, #tpu.memory_space<vmem>>, %arg6: memref<1x128xf32, #tpu.memory_space<vmem>>, %arg7: memref<16x128xf32, #tpu.memory_space<vmem>>, %arg8: memref<16x128xf32, #tpu.memory_space<vmem>>) attributes {dimension_semantics = [#tpu.dimension_semantics<parallel>, #tpu.dimension_semantics<parallel>], iteration_bounds = array<i64: 1, 1>, scalar_prefetch = 0 : i64, scratch_operands = 0 : i64, tpu.core_type = #tpu.core_type<tc>, window_params = [{transform_indices = @transform_0, window_bounds = array<i64: 2, 16, 128>}, {transform_indices = @transform_1, window_bounds = array<i64: 128, 128>}, {transform_indices = @transform_2, window_bounds = array<i64: 128, 128>}, {transform_indices = @transform_3, window_bounds = array<i64: 1, 128>}, {transform_indices = @transform_4, window_bounds = array<i64: 1, 128>}, {transform_indices = @transform_5, window_bounds = array<i64: 16, 128>}, {transform_indices = @transform_6, window_bounds = array<i64: 16, 128>}]} {
    %c0 = arith.constant 0 : index
    %c0_0 = arith.constant 0 : index
    %c0_1 = arith.constant 0 : index
    %0 = vector.load %arg2[%c0, %c0_0, %c0_1] : memref<2x16x128xbf16, #tpu.memory_space<vmem>>, vector<2x16x128xbf16>
    %1 = vector.shape_cast %0 : vector<2x16x128xbf16> to vector<32x128xbf16>
    %c0_2 = arith.constant 0 : index
    %c0_3 = arith.constant 0 : index
    %2 = vector.load %arg3[%c0_2, %c0_3] : memref<128x128xbf16, #tpu.memory_space<vmem>>, vector<128x128xbf16>
    %cst = arith.constant dense<0.000000e+00> : vector<32x128xf32>
    %3 = tpu.matmul %1, %2, %cst {dimension_numbers = #tpu.dot_dimension_numbers<[1], [0], [0], [1], [0, 0, 1, 1], [], []>} : vector<32x128xbf16>, vector<128x128xbf16>, vector<32x128xf32> -> vector<32x128xf32>
    %c0_4 = arith.constant 0 : index
    %c0_5 = arith.constant 0 : index
    %4 = vector.load %arg4[%c0_4, %c0_5] : memref<128x128xbf16, #tpu.memory_space<vmem>>, vector<128x128xbf16>
    %cst_6 = arith.constant dense<0.000000e+00> : vector<32x128xf32>
    %5 = tpu.matmul %1, %4, %cst_6 {dimension_numbers = #tpu.dot_dimension_numbers<[1], [0], [0], [1], [0, 0, 1, 1], [], []>} : vector<32x128xbf16>, vector<128x128xbf16>, vector<32x128xf32> -> vector<32x128xf32>
    %6 = vector.extract_strided_slice %3 {offsets = [0, 0], sizes = [16, 128], strides = [1, 1]} : vector<32x128xf32> to vector<16x128xf32>
    %7 = vector.extract_strided_slice %5 {offsets = [16, 0], sizes = [16, 128], strides = [1, 1]} : vector<32x128xf32> to vector<16x128xf32>
    %8 = arith.subf %6, %7 : vector<16x128xf32>
    %c0_7 = arith.constant 0 : index
    %c0_8 = arith.constant 0 : index
    %9 = vector.load %arg5[%c0_7, %c0_8] : memref<1x128xf32, #tpu.memory_space<vmem>>, vector<1x128xf32>
    %10 = vector.broadcast %9 : vector<1x128xf32> to vector<16x128xf32>
    %11 = arith.addf %8, %10 : vector<16x128xf32>
    %c0_9 = arith.constant 0 : index
    %c0_10 = arith.constant 0 : index
    %12 = vector.load %arg7[%c0_9, %c0_10] : memref<16x128xf32, #tpu.memory_space<vmem>>, vector<16x128xf32>
    tpu.vector_store %arg7[%c0_9, %c0_10], %11 {strides = array<i32>} : memref<16x128xf32, #tpu.memory_space<vmem>>, vector<16x128xf32>,
    %13 = vector.extract_strided_slice %3 {offsets = [16, 0], sizes = [16, 128], strides = [1, 1]} : vector<32x128xf32> to vector<16x128xf32>
    %14 = vector.extract_strided_slice %5 {offsets = [0, 0], sizes = [16, 128], strides = [1, 1]} : vector<32x128xf32> to vector<16x128xf32>
    %15 = arith.addf %13, %14 : vector<16x128xf32>
    %c0_11 = arith.constant 0 : index
    %c0_12 = arith.constant 0 : index
    %16 = vector.load %arg6[%c0_11, %c0_12] : memref<1x128xf32, #tpu.memory_space<vmem>>, vector<1x128xf32>
    %17 = vector.broadcast %16 : vector<1x128xf32> to vector<16x128xf32>
    %18 = arith.addf %15, %17 : vector<16x128xf32>
    %c0_13 = arith.constant 0 : index
    %c0_14 = arith.constant 0 : index
    %19 = vector.load %arg8[%c0_13, %c0_14] : memref<16x128xf32, #tpu.memory_space<vmem>>, vector<16x128xf32>
    tpu.vector_store %arg8[%c0_13, %c0_14], %18 {strides = array<i32>} : memref<16x128xf32, #tpu.memory_space<vmem>>, vector<16x128xf32>,
    return
  }
  func.func @transform_0(%arg0: i32, %arg1: i32) -> (i32, i32, i32) {
    %c0_i32 = arith.constant 0 : i32
    %c0_i32_0 = arith.constant 0 : i32
    %c0_i32_1 = arith.constant 0 : i32
    return %c0_i32, %arg1, %c0_i32_0 : i32, i32, i32
  }
  func.func @transform_1(%arg0: i32, %arg1: i32) -> (i32, i32) {
    %c0_i32 = arith.constant 0 : i32
    %c0_i32_0 = arith.constant 0 : i32
    return %c0_i32, %arg0 : i32, i32
  }
  func.func @transform_2(%arg0: i32, %arg1: i32) -> (i32, i32) {
    %c0_i32 = arith.constant 0 : i32
    %c0_i32_0 = arith.constant 0 : i32
    return %c0_i32, %arg0 : i32, i32
  }
  func.func @transform_3(%arg0: i32, %arg1: i32) -> (i32, i32) {
    %c0_i32 = arith.constant 0 : i32
    %c0_i32_0 = arith.constant 0 : i32
    return %c0_i32, %arg0 : i32, i32
  }
  func.func @transform_4(%arg0: i32, %arg1: i32) -> (i32, i32) {
    %c0_i32 = arith.constant 0 : i32
    %c0_i32_0 = arith.constant 0 : i32
    return %c0_i32, %arg0 : i32, i32
  }
  func.func @transform_5(%arg0: i32, %arg1: i32) -> (i32, i32) {
    %c0_i32 = arith.constant 0 : i32
    return %arg1, %arg0 : i32, i32
  }
  func.func @transform_6(%arg0: i32, %arg1: i32) -> (i32, i32) {
    %c0_i32 = arith.constant 0 : i32
    return %arg1, %arg0 : i32, i32
  }
}

</mosaic_0001>

<bundles_post_ra>
// kernel: tpu_custom_call.1
= control target key start
LH: loop header
LB: loop body
LE: loop exit
PB: predicated region body
PF: predicated region fallthrough
CT: control target
= control target key end

     0   :  { %12 = vsyncpa [#allocation3], 0  ;;  %s726_s0 = inlined_call_operand.hbm [shape: bf16[2,16,128], index: 0, kind: input, shape index: {}]   ;;  %s727_s1 = inlined_call_operand.hbm [shape: bf16[128,128], index: 1, kind: input, shape index: {}]   ;;  %s728_s2 = inlined_call_operand.hbm [shape: bf16[128,128], index: 2, kind: input, shape index: {}]   ;;  %s729_s3 = inlined_call_operand.vmem [shape: f32[1,128], index: 3, kind: input, shape index: {}]   ;;  %s730_s4 = inlined_call_operand.vmem [shape: f32[1,128], index: 4, kind: input, shape index: {}]   ;;  %s731_s5 = inlined_call_operand.hbm [shape: f32[16,128], index: 5, kind: output, shape index: {0}]   ;;  %s732_s6 = inlined_call_operand.hbm [shape: f32[16,128], index: 6, kind: output, shape index: {1}]  }
   0x1   :  { %13 = vsyncpa [#allocation6], 0 }
   0x2   :  { %14 = vsyncpa [#allocation4], 0 }
   0x3   :  { %15 = vsyncpa [#allocation10], 0  ;;  %s593_s21 = smov [#allocation5]   ;;  %s594_s23 = smov [#allocation2]  }
   0x4   :  { %s33_s22 = sshll.u32 %s593_s21, 4  ;;  %s21_s24 = sshll.u32 %s594_s23, 4  ;;  %s34_s22 = int_to_ptr.vmem [resolvable:$true] %s33_s22  ;;  %s637_s24 = int_to_ptr.vmem [resolvable:$true] %s21_s24 }
   0x5   :  { %s475_s27 = scalar_lea.hbm %s727_s1, 1024 }
   0x6   :  { %p476_p0 = scmp.ne.s32.totalorder %s727_s1, %s475_s27  ;;  %p479_p1 = scmp.lt.u32.totalorder %s475_s27, %s727_s1 }
   0x8   :  { %p481_p2 = pnand %p479_p1, %p476_p0 }
   0xa   :  { %484 = shalt.err (!%p481_p2)
}
   0xb   :  { %s485_s8 = scalar_lea.vmem %s34_s22, 1024  ;;  %p490_p4 = scmp.lt.s32.totalorder %s34_s22, %s34_s22 }
   0xc   :  { %p486_p3 = scmp.ne.s32.totalorder %s34_s22, %s485_s8  ;;  %p491_p5 = scmp.lt.s32.totalorder %s485_s8, %s485_s8 }
   0xe   :  { %p492_p6 = por %p491_p5, %p490_p4 }
  0x10   :  { %p493_p7 = pnand %p492_p6, %p486_p3 }
  0x12   :  { %496 = shalt.err (!%p493_p7)
}
  0x13   :  { %s595_s9 = smov 64   ;;  %s596_s10 = smov 4  }
  0x14   :  { %39 = dma.hbm_to_vmem [thread:$0]  %s727_s1, 1024, %s34_s22, [#allocation6], %s595_s9, %s595_s9, %s596_s10  }
  0x15   :  { %s497_s15 = scalar_lea.hbm %s726_s0, 256 }
  0x16   :  { %p498_p8 = scmp.ne.s32.totalorder %s726_s0, %s497_s15  ;;  %p501_p9 = scmp.lt.u32.totalorder %s497_s15, %s726_s0 }
  0x18   :  { %p503_p10 = pnand %p501_p9, %p498_p8 }
  0x1a   :  { %506 = shalt.err (!%p503_p10)
}
  0x1b   :  { %s507_s20 = scalar_lea.vmem %s637_s24, 256  ;;  %p512_p12 = scmp.lt.s32.totalorder %s637_s24, %s637_s24 }
  0x1c   :  { %p508_p11 = scmp.ne.s32.totalorder %s637_s24, %s507_s20  ;;  %p513_p13 = scmp.lt.s32.totalorder %s507_s20, %s507_s20 }
  0x1e   :  { %p514_p0 = por %p513_p13, %p512_p12 }
  0x20   :  { %p515_p1 = pnand %p514_p0, %p508_p11 }
  0x22   :  { %518 = shalt.err (!%p515_p1)
}
  0x23   :  { %27 = dma.hbm_to_vmem [thread:$0]  %s726_s0, 256, %s637_s24, [#allocation3], %s595_s9, %s595_s9, %s596_s10  }
  0x24   :  { %s597_s22 = smov [#allocation7]   ;;  %s519_s27 = scalar_lea.hbm %s728_s2, 1024 }
  0x25   :  { %s45_s23 = sshll.u32 %s597_s22, 4  ;;  %p520_p2 = scmp.ne.s32.totalorder %s728_s2, %s519_s27  ;;  %s46_s23 = int_to_ptr.vmem [resolvable:$true] %s45_s23 }
  0x26   :  { %p523_p3 = scmp.lt.u32.totalorder %s519_s27, %s728_s2 }
  0x28   :  { %p525_p4 = pnand %p523_p3, %p520_p2 }
  0x2a   :  { %528 = shalt.err (!%p525_p4)
}
  0x2b   :  { %s529_s8 = scalar_lea.vmem %s46_s23, 1024  ;;  %p534_p6 = scmp.lt.s32.totalorder %s46_s23, %s46_s23 }
  0x2c   :  { %p530_p5 = scmp.ne.s32.totalorder %s46_s23, %s529_s8  ;;  %p535_p7 = scmp.lt.s32.totalorder %s529_s8, %s529_s8 }
  0x2e   :  { %p536_p8 = por %p535_p7, %p534_p6 }
  0x30   :  { %p537_p9 = pnand %p536_p8, %p530_p5 }
  0x32   :  { %540 = shalt.err (!%p537_p9)
}
  0x33   :  { %51 = dma.hbm_to_vmem [thread:$0]  %s728_s2, 1024, %s46_s23, [#allocation6], %s595_s9, %s595_s9, %s596_s10  }
  0x34   :  { %585 = dma.done.wait [#allocation3], 256  }
  0x35   :  { %586 = vsyncadd [#allocation3], 4294967040 }
  0x36   :  { %587 = dma.done.wait [#allocation6], 2048  }
  0x37   :  { %588 = vsyncadd [#allocation6], 4294965248  ;;  %v457_v0 = vld [vmem:[#allocation5] sm:$0xff]   ;;  %v459_v2 = vld [vmem:[#allocation5 + $0x8] sm:$0xff]   ;;  %s598_s12 = smov [#allocation8]   ;;  %s599_s14 = smov [#allocation9]  }
  0x38   :  { %v458_v1 = vld [vmem:[#allocation7] sm:$0xff]   ;;  %408 = vmatprep.subr.bf16.mxu0 %v457_v0  ;;  %v460_v3 = vld [vmem:[#allocation7 + $0x8] sm:$0xff]   ;;  %v461_v4 = vld [vmem:[#allocation5 + $0x10] sm:$0xff]   ;;  %s339_s13 = sshll.u32 %s598_s12, 4  ;;  %s351_s15 = sshll.u32 %s599_s14, 4  ;;  %s340_s13 = int_to_ptr.vmem [resolvable:$true] %s339_s13  ;;  %s695_s15 = int_to_ptr.vmem [resolvable:$true] %s351_s15 }
  0x39   :  { %428 = vmatprep.subr.bf16.mxu1 %v458_v1  ;;  %409 = vmatpush3.bf16.msra.mxu0 %v457_v0  ;;  %v462_v5 = vld [vmem:[#allocation7 + $0x10] sm:$0xff]   ;;  %v463_v6 = vld [vmem:[#allocation5 + $0x18] sm:$0xff]   ;;  %v465_v8 = vld [vmem:[#allocation5 + $0x20] sm:$0xff]   ;;  %p546_p11 = scmp.lt.s32.totalorder %s340_s13, %s340_s13 }
  0x3a   :  { %429 = vmatpush3.bf16.msra.mxu1 %v458_v1  ;;  %410 = vmatprep.subr.bf16.mxu0 %v459_v2  ;;  %v464_v7 = vld [vmem:[#allocation7 + $0x18] sm:$0xff]   ;;  %v466_v9 = vld [vmem:[#allocation7 + $0x20] sm:$0xff]   ;;  %v467_v10 = vld [vmem:[#allocation5 + $0x28] sm:$0xff]  }
  0x3b   :  { %430 = vmatprep.subr.bf16.mxu1 %v460_v3  ;;  %v473_v11 = vld [vmem:[#allocation2] sm:$0xff]   ;;  %v468_v12 = vld [vmem:[#allocation7 + $0x28] sm:$0xff]   ;;  %v471_v15 = vld [vmem:[#allocation5 + $0x38] sm:$0xff]  }
  0x3c   :  { %424 = vmatprep.mubr.bf16.mxu0 %v473_v11  ;;  %444 = vmatprep.mubr.bf16.mxu1 %v473_v11  ;;  %v469_v13 = vld [vmem:[#allocation5 + $0x30] sm:$0xff]   ;;  %v472_v16 = vld [vmem:[#allocation7 + $0x38] sm:$0xff]  }
  0x3d   :  { %411 = vmatpush3.bf16.msra.mxu0 %v459_v2  ;;  %v470_v14 = vld [vmem:[#allocation7 + $0x30] sm:$0xff]   ;;  %v474_v17 = vld [vmem:[#allocation2 + $0x8] sm:$0xff]  }
  0x3e   :  { %431 = vmatpush3.bf16.msra.mxu1 %v460_v3  ;;  %412 = vmatprep.subr.bf16.mxu0 %v461_v4  ;;  %v386_v21 = vld [vmem:[%s729_s3] ss:$0 sm:$0xff]  ;;  %s541_s3 = scalar_lea.vmem %s340_s13, 256 }
  0x3f   :  { %432 = vmatprep.subr.bf16.mxu1 %v462_v5  ;;  %v387_v24 = vld [vmem:[%s730_s4] ss:$0 sm:$0xff]  ;;  %p542_p10 = scmp.ne.s32.totalorder %s340_s13, %s541_s3  ;;  %p547_p12 = scmp.lt.s32.totalorder %s541_s3, %s541_s3 }
  0x41   :  { %413 = vmatpush3.bf16.msra.mxu0 %v461_v4  ;;  %p548_p13 = por %p547_p12, %p546_p11 }
  0x42   :  { %433 = vmatpush3.bf16.msra.mxu1 %v462_v5  ;;  %414 = vmatprep.subr.bf16.mxu0 %v463_v6 }
  0x43   :  { %434 = vmatprep.subr.bf16.mxu1 %v464_v7  ;;  %p549_p0 = pnand %p548_p13, %p542_p10 }
  0x45   :  { %415 = vmatpush3.bf16.msra.mxu0 %v463_v6 }
  0x46   :  { %435 = vmatpush3.bf16.msra.mxu1 %v464_v7  ;;  %416 = vmatprep.subr.bf16.mxu0 %v465_v8 }
  0x47   :  { %436 = vmatprep.subr.bf16.mxu1 %v466_v9 }
  0x49   :  { %417 = vmatpush3.bf16.msra.mxu0 %v465_v8 }
  0x4a   :  { %437 = vmatpush3.bf16.msra.mxu1 %v466_v9  ;;  %418 = vmatprep.subr.bf16.mxu0 %v467_v10 }
  0x4b   :  { %438 = vmatprep.subr.bf16.mxu1 %v468_v12 }
  0x4d   :  { %419 = vmatpush3.bf16.msra.mxu0 %v467_v10 }
  0x4e   :  { %439 = vmatpush3.bf16.msra.mxu1 %v468_v12  ;;  %420 = vmatprep.subr.bf16.mxu0 %v469_v13 }
  0x4f   :  { %440 = vmatprep.subr.bf16.mxu1 %v470_v14 }
  0x51   :  { %421 = vmatpush3.bf16.msra.mxu0 %v469_v13 }
  0x52   :  { %441 = vmatpush3.bf16.msra.mxu1 %v470_v14  ;;  %422 = vmatprep.subr.bf16.mxu0 %v471_v15 }
  0x53   :  { %442 = vmatprep.subr.bf16.mxu1 %v472_v16 }
  0x55   :  { %423 = vmatpush3.bf16.msra.mxu0 %v471_v15 }
  0x56   :  { %443 = vmatpush3.bf16.msra.mxu1 %v472_v16 }
  0x58   :  { %425 = vmatmul.mubr.bf16.vlgmr.msra.gmra.mrb[0].mxu0 %v474_v17 }
  0x59   :  { %445 = vmatmul.mubr.bf16.vlgmr.msra.gmra.mrb[0].mxu1 %v474_v17 }
 0x12b   :  { %v426_v18 = vpop.f32.mrb[0].mxu0 }
 0x12c   :  { %v446_v19 = vpop.f32.mrb[0].mxu1  ;;  %v180_v20 = vpop.f32.mrb[1].mxu0 }
 0x12d   :  { %v308_v22 = vsub.f32 %v180_v20, %v446_v19  ;;  %v293_v23 = vpop.f32.mrb[1].mxu1  ;;  %v427_v25 = vpop.f32.mrb[2].mxu0 }
 0x12e   :  { %v321_v26 = vadd.f32 %v426_v18, %v293_v23  ;;  %v447_v27 = vpop.f32.mrb[2].mxu1  ;;  %v183_v28 = vpop.f32.mrb[3].mxu0 }
 0x12f   :  { %v317_v29 = vadd.f32 %v386_v21, %v308_v22  ;;  %v309_v30 = vsub.f32 %v183_v28, %v447_v27  ;;  %v296_v31 = vpop.f32.mrb[3].mxu1 }
 0x130   :  { %v330_v32 = vadd.f32 %v387_v24, %v321_v26  ;;  %v322_v33 = vadd.f32 %v427_v25, %v296_v31 }
 0x131   :  { %319 = vst [vmem:[#allocation8] sm:$0xff] %v317_v29  ;;  %v318_v34 = vadd.f32 %v386_v21, %v309_v30 }
 0x132   :  { %332 = vst [vmem:[#allocation9] sm:$0xff] %v330_v32  ;;  %v331_v35 = vadd.f32 %v387_v24, %v322_v33 }
 0x133   :  { %320 = vst [vmem:[#allocation8 + $0x8] sm:$0xff] %v318_v34 }
 0x134   :  { %333 = vst [vmem:[#allocation9 + $0x8] sm:$0xff] %v331_v35 }
 0x135   :  { %552 = shalt.err (!%p549_p0)
}
 0x136   :  { %s553_s17 = scalar_lea.hbm %s731_s5, 256 }
 0x137   :  { %p554_p1 = scmp.ne.s32.totalorder %s731_s5, %s553_s17  ;;  %p557_p2 = scmp.lt.u32.totalorder %s553_s17, %s731_s5 }
 0x139   :  { %p559_p3 = pnand %p557_p2, %p554_p1 }
 0x13b   :  { %562 = shalt.err (!%p559_p3)
}
 0x13c   :  { %s600_s21 = smov 128   ;;  %s601_s22 = smov 8  }
 0x13d   :  { %345 = dma.vmem_to_hbm [thread:$0]  %s340_s13, 256, %s731_s5, [#allocation4], %s600_s21, %s600_s21, %s601_s22  }
 0x13e   :  { %s563_s26 = scalar_lea.vmem %s695_s15, 256  ;;  %p568_p5 = scmp.lt.s32.totalorder %s695_s15, %s695_s15 }
 0x13f   :  { %p564_p4 = scmp.ne.s32.totalorder %s695_s15, %s563_s26  ;;  %p569_p6 = scmp.lt.s32.totalorder %s563_s26, %s563_s26 }
 0x141   :  { %p570_p7 = por %p569_p6, %p568_p5 }
 0x143   :  { %p571_p8 = pnand %p570_p7, %p564_p4 }
 0x145   :  { %574 = shalt.err (!%p571_p8)
}
 0x146   :  { %s575_s29 = scalar_lea.hbm %s732_s6, 256 }
 0x147   :  { %p576_p9 = scmp.ne.s32.totalorder %s732_s6, %s575_s29  ;;  %p579_p10 = scmp.lt.u32.totalorder %s575_s29, %s732_s6 }
 0x149   :  { %p581_p11 = pnand %p579_p10, %p576_p9 }
 0x14b   :  { %584 = shalt.err (!%p581_p11)
}
 0x14c   :  { %357 = dma.vmem_to_hbm [thread:$0]  %s695_s15, 256, %s732_s6, [#allocation10], %s600_s21, %s600_s21, %s601_s22  }
 0x14d   :  { %589 = dma.done.wait [#allocation4], 256  }
 0x14e   :  { %590 = vsyncadd [#allocation4], 4294967040 }
 0x14f   :  { %591 = dma.done.wait [#allocation10], 256  }
 0x150   :  { %592 = vsyncadd [#allocation10], 4294967040 }
 0x151   :  { %364 = vsyncpa [#allocation3], 1 }
 0x152   :  { %365 = vsyncpa [#allocation6], 1 }
 0x153   :  { %366 = vsyncpa [#allocation4], 1 }
 0x154   :  { %367 = vsyncpa [#allocation10], 1 }

</bundles_post_ra>
